<compile_context>
chip_gen: v5e
topology: v5e:2x2
jax: 0.10.0
libtpu: 0.0.40
codegen_flags: <defaults>
</compile_context>

<pallas_src>
import jax
import jax.numpy as jnp
from jax.experimental import pallas as pl
from jax.experimental.pallas import tpu as pltpu

HIDDEN1 = 64        # logical conv1 width (matches torch module)
HIDDEN1_PAD = 128   # lane-dense padded width (zero padding == numerically identical)
HIDDEN2 = 128


def _round_up(x, m):
    return ((x + m - 1) // m) * m


def _full_spec(shape):
    # Whole-array block resident in VMEM (used only on the small fused path).
    return pl.BlockSpec(shape, lambda: (0,) * len(shape))


# --------------------------- fused path (small N) --------------------------- #

def fused_gcn_kernel(a_ref, x_ref, w1_ref, b1_ref, w2_ref, b2_ref,
                     p_ref, fcw_ref, fcb_ref, o_ref):
    a = a_ref[...]                                                    # [Np, Np] bf16
    # layer 1: relu(A_hat @ (X @ W1) + b1)
    xw1 = jnp.dot(x_ref[...], w1_ref[...], preferred_element_type=jnp.float32)
    h1 = jnp.maximum(
        jnp.dot(a, xw1.astype(jnp.bfloat16), preferred_element_type=jnp.float32)
        + b1_ref[...], 0.0)
    # layer 2: relu(A_hat @ (H1 @ W2) + b2)
    xw2 = jnp.dot(h1, w2_ref[...], preferred_element_type=jnp.float32)
    h2 = jnp.maximum(
        jnp.dot(a, xw2.astype(jnp.bfloat16), preferred_element_type=jnp.float32)
        + b2_ref[...], 0.0)
    # global mean pool + FC + log_softmax (padded classes carry -1e30 bias -> exp==0)
    pooled = jnp.dot(p_ref[...], h2, preferred_element_type=jnp.float32)
    logits = jnp.dot(pooled, fcw_ref[...],
                     preferred_element_type=jnp.float32) + fcb_ref[...]
    m = jnp.max(logits, axis=1, keepdims=True)
    shifted = logits - m
    lse = jnp.log(jnp.sum(jnp.exp(shifted), axis=1, keepdims=True))
    o_ref[...] = shifted - lse


def fused_gcn(a_bf16, x, w1, b1, w2, b2, p_mat, fc_w, fc_b):
    g_pad, c_pad = p_mat.shape[0], fc_w.shape[1]
    return pl.pallas_call(
        fused_gcn_kernel,
        out_shape=jax.ShapeDtypeStruct((g_pad, c_pad), jnp.float32),
        in_specs=[_full_spec(a_bf16.shape), _full_spec(x.shape),
                  _full_spec(w1.shape), _full_spec(b1.shape),
                  _full_spec(w2.shape), _full_spec(b2.shape),
                  _full_spec(p_mat.shape), _full_spec(fc_w.shape),
                  _full_spec(fc_b.shape)],
        out_specs=_full_spec((g_pad, c_pad)),
        compiler_params=pltpu.CompilerParams(vmem_limit_bytes=32 * 1024 * 1024),
    )(a_bf16, x, w1, b1, w2, b2, p_mat, fc_w, fc_b)


# --------------------------- tiled path (large N) ---------------------------- #

def xw_kernel(x_ref, w_ref, o_ref):
    # Hoisted feature transform: XW = X @ W, emitted in bf16 for the A_hat matmul.
    o_ref[...] = jnp.dot(x_ref[...], w_ref[...],
                         preferred_element_type=jnp.float32).astype(o_ref.dtype)


def dense_xw(x, w, tile_m):
    n, f_in = x.shape
    f_out = w.shape[1]
    return pl.pallas_call(
        xw_kernel,
        out_shape=jax.ShapeDtypeStruct((n, f_out), jnp.bfloat16),
        grid=(n // tile_m,),
        in_specs=[pl.BlockSpec((tile_m, f_in), lambda i: (i, 0)),
                  pl.BlockSpec((f_in, f_out), lambda i: (0, 0))],
        out_specs=pl.BlockSpec((tile_m, f_out), lambda i: (i, 0)),
        compiler_params=pltpu.CompilerParams(
            dimension_semantics=("parallel",),
            vmem_limit_bytes=32 * 1024 * 1024),
    )(x, w)


def aggregate_kernel(a_ref, xw_ref, b_ref, o_ref, acc_ref):
    k = pl.program_id(1)

    @pl.when(k == 0)
    def _():
        acc_ref[...] = jnp.zeros_like(acc_ref)

    acc_ref[...] += jnp.dot(a_ref[...], xw_ref[...],
                            preferred_element_type=jnp.float32)

    @pl.when(k == pl.num_programs(1) - 1)
    def _():
        o_ref[...] = jnp.maximum(acc_ref[...] + b_ref[...], 0.0)


def gcn_aggregate(a_bf16, xw_bf16, b, tile_m, tile_k):
    n = a_bf16.shape[0]
    f_out = xw_bf16.shape[1]
    return pl.pallas_call(
        aggregate_kernel,
        out_shape=jax.ShapeDtypeStruct((n, f_out), jnp.float32),
        grid=(n // tile_m, n // tile_k),
        in_specs=[pl.BlockSpec((tile_m, tile_k), lambda i, k: (i, k)),
                  pl.BlockSpec((tile_k, f_out), lambda i, k: (k, 0)),
                  pl.BlockSpec((1, f_out), lambda i, k: (0, 0))],
        out_specs=pl.BlockSpec((tile_m, f_out), lambda i, k: (i, 0)),
        scratch_shapes=[pltpu.VMEM((tile_m, f_out), jnp.float32)],
        compiler_params=pltpu.CompilerParams(
            dimension_semantics=("parallel", "arbitrary"),
            vmem_limit_bytes=32 * 1024 * 1024),
    )(a_bf16, xw_bf16, b)


def head_kernel(p_ref, h_ref, fcw_ref, fcb_ref, o_ref, acc_ref):
    k = pl.program_id(0)

    @pl.when(k == 0)
    def _():
        acc_ref[...] = jnp.zeros_like(acc_ref)

    acc_ref[...] += jnp.dot(p_ref[...], h_ref[...],
                            preferred_element_type=jnp.float32)

    @pl.when(k == pl.num_programs(0) - 1)
    def _():
        logits = jnp.dot(acc_ref[...], fcw_ref[...],
                         preferred_element_type=jnp.float32) + fcb_ref[...]
        m = jnp.max(logits, axis=1, keepdims=True)
        shifted = logits - m
        lse = jnp.log(jnp.sum(jnp.exp(shifted), axis=1, keepdims=True))
        o_ref[...] = shifted - lse


def head_tiled(p_mat, h, fc_w, fc_b, tile_k):
    g_pad, n = p_mat.shape
    hidden = h.shape[1]
    c_pad = fc_w.shape[1]
    return pl.pallas_call(
        head_kernel,
        out_shape=jax.ShapeDtypeStruct((g_pad, c_pad), jnp.float32),
        grid=(n // tile_k,),
        in_specs=[pl.BlockSpec((g_pad, tile_k), lambda k: (0, k)),
                  pl.BlockSpec((tile_k, hidden), lambda k: (k, 0)),
                  pl.BlockSpec((hidden, c_pad), lambda k: (0, 0)),
                  pl.BlockSpec((1, c_pad), lambda k: (0, 0))],
        out_specs=pl.BlockSpec((g_pad, c_pad), lambda k: (0, 0)),
        scratch_shapes=[pltpu.VMEM((g_pad, hidden), jnp.float32)],
        compiler_params=pltpu.CompilerParams(
            dimension_semantics=("arbitrary",),
            vmem_limit_bytes=32 * 1024 * 1024),
    )(p_mat, h, fc_w, fc_b)


# ------------------------------- JAX glue ----------------------------------- #

def normalized_adjacency(edge_index, num_nodes, n_pad):
    """A_hat = D^-1/2 (A + I) D^-1/2 (PyG GCNConv default norm), padded to n_pad.

    Padded rows/cols are all-zero, so padding is numerically a no-op.
    """
    # TODO(synk): dense O(N^2) A_hat; a sparse/gather message-passing kernel is
    # needed to scale past ~10^4 nodes.
    src, dst = edge_index[0], edge_index[1]
    a = jnp.zeros((n_pad, n_pad), jnp.float32)
    a = a.at[dst, src].add(1.0)                       # scatter-add (src -> dst)
    eye = (jnp.arange(n_pad) < num_nodes).astype(jnp.float32)
    a = a + jnp.diag(eye)                             # self loops for real nodes only
    deg = jnp.sum(a, axis=1)
    d_inv_sqrt = jnp.where(deg > 0, 1.0 / jnp.sqrt(deg), 0.0)
    return a * d_inv_sqrt[:, None] * d_inv_sqrt[None, :]


def mean_pool_matrix(batch, num_graphs, g_pad, num_nodes, n_pad):
    """P[g, n] = 1/|graph g| for real node n in graph g; zeros for padding."""
    node_valid = jnp.arange(n_pad) < num_nodes
    batch_p = jnp.where(node_valid, jnp.pad(batch, (0, n_pad - num_nodes)), -1)
    onehot = (batch_p[None, :] == jnp.arange(g_pad)[:, None]).astype(jnp.float32)
    counts = jnp.sum(onehot, axis=1, keepdims=True)
    return onehot / jnp.maximum(counts, 1.0)


def init_params(key, num_features, num_classes):
    k1, k2, k3 = jax.random.split(key, 3)
    scale = 0.1
    return {
        "w1": scale * jax.random.normal(k1, (num_features, HIDDEN1), jnp.float32),
        "b1": jnp.zeros((HIDDEN1,), jnp.float32),
        "w2": scale * jax.random.normal(k2, (HIDDEN1, HIDDEN2), jnp.float32),
        "b2": jnp.zeros((HIDDEN2,), jnp.float32),
        # torch Linear(128, C) stores weight [C, 128]; we keep it pre-transposed.
        "fc_w": scale * jax.random.normal(k3, (HIDDEN2, num_classes), jnp.float32),
        "fc_b": jnp.zeros((num_classes,), jnp.float32),
    }


def _prepare_params(params, num_classes):
    """Lane-dense padding: hidden1 64->128 (zeros) and classes ->128.

    Zero-padded hidden columns stay exactly zero through ReLU and multiply
    zero rows of W2; padded classes get a -1e30 bias so exp()==0 in log_softmax.
    """
    c_pad = max(_round_up(num_classes, 128), 128)
    f_in = params["w1"].shape[0]
    w1 = jnp.zeros((f_in, HIDDEN1_PAD), jnp.float32).at[:, :HIDDEN1].set(params["w1"])
    b1 = jnp.zeros((1, HIDDEN1_PAD), jnp.float32).at[0, :HIDDEN1].set(params["b1"])
    w2 = jnp.zeros((HIDDEN1_PAD, HIDDEN2), jnp.float32).at[:HIDDEN1, :].set(params["w2"])
    b2 = params["b2"].reshape(1, HIDDEN2)
    fc_w = jnp.zeros((HIDDEN2, c_pad), jnp.float32).at[:, :num_classes].set(params["fc_w"])
    fc_b = jnp.full((1, c_pad), -1e30, jnp.float32).at[0, :num_classes].set(params["fc_b"])
    return dict(w1=w1, b1=b1, w2=w2, b2=b2, fc_w=fc_w, fc_b=fc_b, c_pad=c_pad)


def gcn_forward(params, x, edge_index, batch, num_graphs, num_classes,
                *, tile=512, force_tiled=False):
    n, f_in = x.shape
    pp = _prepare_params(params, num_classes)
    g_pad = _round_up(max(num_graphs, 8), 8)

    # Choose fused single-launch path when the whole problem comfortably fits VMEM
    # (A_hat read once from HBM); otherwise the tiled, pipelined path.
    n_fused = _round_up(max(n, 8), 8)
    fused_bytes = (n_fused * n_fused * 2                 # A_hat (bf16)
                   + n_fused * (f_in + 3 * 128) * 4      # X + h1/h2/xw intermediates
                   + g_pad * n_fused * 4)                # pooling matrix
    use_fused = (not force_tiled) and fused_bytes < 24 * 1024 * 1024

    n_pad = n_fused if use_fused else _round_up(max(n, tile), tile)

    a_hat = normalized_adjacency(edge_index, n, n_pad).astype(jnp.bfloat16)
    p_mat = mean_pool_matrix(batch, num_graphs, g_pad, n, n_pad)
    x_p = jnp.zeros((n_pad, f_in), jnp.float32).at[:n, :].set(x)

    if use_fused:
        out = fused_gcn(a_hat, x_p, pp["w1"], pp["b1"], pp["w2"], pp["b2"],
                        p_mat, pp["fc_w"], pp["fc_b"])
    else:
        xw1 = dense_xw(x_p, pp["w1"], tile)                       # [Np, 128] bf16
        h1 = gcn_aggregate(a_hat, xw1, pp["b1"], tile, tile)      # [Np, 128] f32
        xw2 = dense_xw(h1, pp["w2"], tile)                        # [Np, 128] bf16
        h2 = gcn_aggregate(a_hat, xw2, pp["b2"], tile, tile)      # [Np, 128] f32
        out = head_tiled(p_mat, h2, pp["fc_w"], pp["fc_b"], tile)
    return out[:num_graphs, :num_classes]


def gcn_reference(params, x, edge_index, batch, num_graphs, num_classes):
    """Plain-JAX reference mirroring the kernels' bf16 A_hat / XW casts."""
    n = x.shape[0]
    a = normalized_adjacency(edge_index, n, n).astype(jnp.bfloat16).astype(jnp.float32)
    onehot = (batch[None, :] == jnp.arange(num_graphs)[:, None]).astype(jnp.float32)
    p = onehot / jnp.maximum(jnp.sum(onehot, axis=1, keepdims=True), 1.0)
    xw1 = (x @ params["w1"]).astype(jnp.bfloat16).astype(jnp.float32)
    h1 = jnp.maximum(a @ xw1 + params["b1"][None, :], 0.0)
    xw2 = (h1 @ params["w2"]).astype(jnp.bfloat16).astype(jnp.float32)
    h2 = jnp.maximum(a @ xw2 + params["b2"][None, :], 0.0)
    logits = (p @ h2) @ params["fc_w"] + params["fc_b"][None, :]
    return jax.nn.log_softmax(logits, axis=1)


if __name__ == "__main__":
    num_features = 8
    num_classes = 4

    key = jax.random.PRNGKey(0)
    k_params, k_x1, k_x2 = jax.random.split(key, 3)
    params = init_params(k_params, num_features, num_classes)

    def make_ring_graphs(num_graphs, nodes_per_graph, k_x):
        num_nodes = num_graphs * nodes_per_graph
        xg = jax.random.normal(k_x, (num_nodes, num_features), jnp.float32)
        edges = []
        for g in range(num_graphs):
            base = g * nodes_per_graph
            for i in range(nodes_per_graph):
                u = base + i
                v = base + (i + 1) % nodes_per_graph
                edges.append((u, v))
                edges.append((v, u))
        edge_index = jnp.array(edges, dtype=jnp.int32).T              # [2, E]
        batch = jnp.repeat(jnp.arange(num_graphs, dtype=jnp.int32), nodes_per_graph)
        return xg, edge_index, batch

    # --- small graph (2 rings x 8 nodes): fused single-launch path -----------
    x, ei, batch = make_ring_graphs(2, 8, k_x1)
    out = gcn_forward(params, x, ei, batch, 2, num_classes)
    out = jax.block_until_ready(out)
    ref = gcn_reference(params, x, ei, batch, 2, num_classes)
    assert out.shape == (2, num_classes)
    assert bool(jnp.all(jnp.abs(jnp.sum(jnp.exp(out), axis=1) - 1.0) < 1e-4))
    assert bool(jnp.max(jnp.abs(out - ref)) < 5e-2)

    # --- larger graph (3 rings x 100 nodes): tiled / pipelined path ----------
    x2, ei2, batch2 = make_ring_graphs(3, 100, k_x2)
    out2 = gcn_forward(params, x2, ei2, batch2, 3, num_classes,
                       tile=128, force_tiled=True)
    out2 = jax.block_until_ready(out2)
    ref2 = gcn_reference(params, x2, ei2, batch2, 3, num_classes)
    assert out2.shape == (3, num_classes)
    assert bool(jnp.all(jnp.abs(jnp.sum(jnp.exp(out2), axis=1) - 1.0) < 1e-4))
    assert bool(jnp.max(jnp.abs(out2 - ref2)) < 5e-2)

    print("KERNEL_OK")
</pallas_src>

<mosaic_0001>
module attributes {stable_mosaic.version = 11 : i64} {
  func.func @fused_gcn_kernel(%arg0: memref<16x16xbf16, #tpu.memory_space<vmem>>, %arg1: memref<16x8xf32, #tpu.memory_space<vmem>>, %arg2: memref<8x128xf32, #tpu.memory_space<vmem>>, %arg3: memref<1x128xf32, #tpu.memory_space<vmem>>, %arg4: memref<128x128xf32, #tpu.memory_space<vmem>>, %arg5: memref<1x128xf32, #tpu.memory_space<vmem>>, %arg6: memref<8x16xf32, #tpu.memory_space<vmem>>, %arg7: memref<128x128xf32, #tpu.memory_space<vmem>>, %arg8: memref<1x128xf32, #tpu.memory_space<vmem>>, %arg9: memref<8x128xf32, #tpu.memory_space<vmem>>) attributes {dimension_semantics = [], scalar_prefetch = 0 : i64, scratch_operands = 0 : i64, tpu.core_type = #tpu.core_type<tc>} {
    %c0 = arith.constant 0 : index
    %c0_0 = arith.constant 0 : index
    %0 = vector.load %arg0[%c0, %c0_0] : memref<16x16xbf16, #tpu.memory_space<vmem>>, vector<16x16xbf16>
    %c0_1 = arith.constant 0 : index
    %c0_2 = arith.constant 0 : index
    %1 = vector.load %arg1[%c0_1, %c0_2] : memref<16x8xf32, #tpu.memory_space<vmem>>, vector<16x8xf32>
    %c0_3 = arith.constant 0 : index
    %c0_4 = arith.constant 0 : index
    %2 = vector.load %arg2[%c0_3, %c0_4] : memref<8x128xf32, #tpu.memory_space<vmem>>, vector<8x128xf32>
    %cst = arith.constant dense<0.000000e+00> : vector<16x128xf32>
    %3 = tpu.matmul %1, %2, %cst {dimension_numbers = #tpu.dot_dimension_numbers<[1], [0], [0], [1], [0, 0, 1, 1], [], []>} : vector<16x8xf32>, vector<8x128xf32>, vector<16x128xf32> -> vector<16x128xf32>
    %4 = arith.truncf %3 : vector<16x128xf32> to vector<16x128xbf16>
    %cst_5 = arith.constant dense<0.000000e+00> : vector<16x128xf32>
    %5 = tpu.matmul %0, %4, %cst_5 {dimension_numbers = #tpu.dot_dimension_numbers<[1], [0], [0], [1], [0, 0, 1, 1], [], []>} : vector<16x16xbf16>, vector<16x128xbf16>, vector<16x128xf32> -> vector<16x128xf32>
    %c0_6 = arith.constant 0 : index
    %c0_7 = arith.constant 0 : index
    %6 = vector.load %arg3[%c0_6, %c0_7] : memref<1x128xf32, #tpu.memory_space<vmem>>, vector<1x128xf32>
    %7 = vector.broadcast %6 : vector<1x128xf32> to vector<16x128xf32>
    %8 = arith.addf %5, %7 : vector<16x128xf32>
    %cst_8 = arith.constant 0.000000e+00 : f32
    %9 = vector.broadcast %cst_8 : f32 to vector<16x128xf32>
    %10 = arith.maximumf %8, %9 : vector<16x128xf32>
    %c0_9 = arith.constant 0 : index
    %c0_10 = arith.constant 0 : index
    %11 = vector.load %arg4[%c0_9, %c0_10] : memref<128x128xf32, #tpu.memory_space<vmem>>, vector<128x128xf32>
    %cst_11 = arith.constant dense<0.000000e+00> : vector<16x128xf32>
    %12 = tpu.matmul %10, %11, %cst_11 {dimension_numbers = #tpu.dot_dimension_numbers<[1], [0], [0], [1], [0, 0, 1, 1], [], []>} : vector<16x128xf32>, vector<128x128xf32>, vector<16x128xf32> -> vector<16x128xf32>
    %13 = arith.truncf %12 : vector<16x128xf32> to vector<16x128xbf16>
    %cst_12 = arith.constant dense<0.000000e+00> : vector<16x128xf32>
    %14 = tpu.matmul %0, %13, %cst_12 {dimension_numbers = #tpu.dot_dimension_numbers<[1], [0], [0], [1], [0, 0, 1, 1], [], []>} : vector<16x16xbf16>, vector<16x128xbf16>, vector<16x128xf32> -> vector<16x128xf32>
    %c0_13 = arith.constant 0 : index
    %c0_14 = arith.constant 0 : index
    %15 = vector.load %arg5[%c0_13, %c0_14] : memref<1x128xf32, #tpu.memory_space<vmem>>, vector<1x128xf32>
    %16 = vector.broadcast %15 : vector<1x128xf32> to vector<16x128xf32>
    %17 = arith.addf %14, %16 : vector<16x128xf32>
    %cst_15 = arith.constant 0.000000e+00 : f32
    %18 = vector.broadcast %cst_15 : f32 to vector<16x128xf32>
    %19 = arith.maximumf %17, %18 : vector<16x128xf32>
    %c0_16 = arith.constant 0 : index
    %c0_17 = arith.constant 0 : index
    %20 = vector.load %arg6[%c0_16, %c0_17] : memref<8x16xf32, #tpu.memory_space<vmem>>, vector<8x16xf32>
    %cst_18 = arith.constant dense<0.000000e+00> : vector<8x128xf32>
    %21 = tpu.matmul %20, %19, %cst_18 {dimension_numbers = #tpu.dot_dimension_numbers<[1], [0], [0], [1], [0, 0, 1, 1], [], []>} : vector<8x16xf32>, vector<16x128xf32>, vector<8x128xf32> -> vector<8x128xf32>
    %c0_19 = arith.constant 0 : index
    %c0_20 = arith.constant 0 : index
    %22 = vector.load %arg7[%c0_19, %c0_20] : memref<128x128xf32, #tpu.memory_space<vmem>>, vector<128x128xf32>
    %cst_21 = arith.constant dense<0.000000e+00> : vector<8x128xf32>
    %23 = tpu.matmul %21, %22, %cst_21 {dimension_numbers = #tpu.dot_dimension_numbers<[1], [0], [0], [1], [0, 0, 1, 1], [], []>} : vector<8x128xf32>, vector<128x128xf32>, vector<8x128xf32> -> vector<8x128xf32>
    %c0_22 = arith.constant 0 : index
    %c0_23 = arith.constant 0 : index
    %24 = vector.load %arg8[%c0_22, %c0_23] : memref<1x128xf32, #tpu.memory_space<vmem>>, vector<1x128xf32>
    %25 = vector.broadcast %24 : vector<1x128xf32> to vector<8x128xf32>
    %26 = arith.addf %23, %25 : vector<8x128xf32>
    %cst_24 = arith.constant dense<0xFF800000> : vector<8xf32>
    %27 = vector.multi_reduction <maximumf>, %26, %cst_24 [1] : vector<8x128xf32> to vector<8xf32>
    %28 = vector.shape_cast %27 : vector<8xf32> to vector<8x1xf32>
    %29 = vector.broadcast %28 : vector<8x1xf32> to vector<8x128xf32>
    %30 = arith.subf %26, %29 : vector<8x128xf32>
    %31 = math.exp %30 : vector<8x128xf32>
    %cst_25 = arith.constant dense<0.000000e+00> : vector<8xf32>
    %32 = vector.multi_reduction <add>, %31, %cst_25 [1] : vector<8x128xf32> to vector<8xf32>
    %33 = vector.shape_cast %32 : vector<8xf32> to vector<8x1xf32>
    %34 = math.log %33 : vector<8x1xf32>
    %35 = vector.broadcast %34 : vector<8x1xf32> to vector<8x128xf32>
    %36 = arith.subf %30, %35 : vector<8x128xf32>
    %c0_26 = arith.constant 0 : index
    %c0_27 = arith.constant 0 : index
    %37 = vector.load %arg9[%c0_26, %c0_27] : memref<8x128xf32, #tpu.memory_space<vmem>>, vector<8x128xf32>
    tpu.vector_store %arg9[%c0_26, %c0_27], %36 {strides = array<i32>} : memref<8x128xf32, #tpu.memory_space<vmem>>, vector<8x128xf32>,
    return
  }
}

</mosaic_0001>

<bundles_post_ra>
// kernel: tpu_custom_call.1
= control target key start
LH: loop header
LB: loop body
LE: loop exit
PB: predicated region body
PF: predicated region fallthrough
CT: control target
= control target key end

     0   :  { %14 = vsyncpa [#allocation3], 0  ;;  %s475_s0 = inlined_call_operand.vmem [shape: bf16[16,16], index: 0, kind: input, shape index: {}]   ;;  %s476_s1 = inlined_call_operand.vmem [shape: f32[16,8], index: 1, kind: input, shape index: {}]   ;;  %s477_s2 = inlined_call_operand.vmem [shape: f32[8,128], index: 2, kind: input, shape index: {}]   ;;  %s478_s3 = inlined_call_operand.vmem [shape: f32[1,128], index: 3, kind: input, shape index: {}]   ;;  %s479_s4 = inlined_call_operand.hbm [shape: f32[128,128], index: 4, kind: input, shape index: {}]   ;;  %s480_s5 = inlined_call_operand.vmem [shape: f32[1,128], index: 5, kind: input, shape index: {}]   ;;  %s481_s6 = inlined_call_operand.vmem [shape: f32[8,16], index: 6, kind: input, shape index: {}]   ;;  %s482_s7 = inlined_call_operand.hbm [shape: f32[128,128], index: 7, kind: input, shape index: {}]   ;;  %s483_s8 = inlined_call_operand.vmem [shape: f32[1,128], index: 8, kind: input, shape index: {}]   ;;  %s484_s9 = inlined_call_operand.hbm [shape: f32[8,128], index: 9, kind: output, shape index: {}]  }
   0x1   :  { %15 = vsyncpa [#allocation6], 0 }
   0x2   :  { %16 = vsyncpa [#allocation4], 0  ;;  %s29_s11 = sshll.u32 %s479_s4, 4  ;;  %s384_s12 = smov [#allocation2]   ;;  %s30_s11 = int_to_ptr.hbm [resolvable:$true] %s29_s11 }
   0x3   :  { %s31_s13 = sshll.u32 %s384_s12, 4  ;;  %s46_s16 = sshll.u32 %s482_s7, 4  ;;  %s32_s13 = int_to_ptr.vmem [resolvable:$true] %s31_s13  ;;  %s47_s16 = int_to_ptr.hbm [resolvable:$true] %s46_s16 }
   0x4   :  { %s385_s17 = smov 128   ;;  %s386_s18 = smov 8  }
   0x5   :  { %37 = dma.hbm_to_vmem [thread:$0]  %s30_s11, 2048, %s32_s13, [#allocation3], %s385_s17, %s385_s17, %s386_s18  }
   0x6   :  { %s387_s19 = smov [#allocation5]  }
   0x7   :  { %s48_s20 = sshll.u32 %s387_s19, 4  ;;  %s49_s20 = int_to_ptr.vmem [resolvable:$true] %s48_s20 }
   0x8   :  { %54 = dma.hbm_to_vmem [thread:$0]  %s47_s16, 2048, %s49_s20, [#allocation6], %s385_s17, %s385_s17, %s386_s18  }
   0x9   :  { %378 = dma.done.wait [#allocation3], 2048  }
   0xa   :  { %379 = vsyncadd [#allocation3], 4294965248 }
   0xb   :  { %380 = dma.done.wait [#allocation6], 2048  }
   0xc   :  { %381 = vsyncadd [#allocation6], 4294965248  ;;  %vm71_vm0 = vcmask 64512   ;;  %v70_v0 = vld [vmem:[%s477_s2] sm:$0xff]  ;;  %v69_v2 = vld [vmem:[%s476_s1 + $0x8] sm:$0xff]  ;;  %vm111_vm1 = vcmask 130048  }
   0xd   :  { %v68_v1 = vld [vmem:[%s476_s1] sm:$0xff]  ;;  %93 = vmatpush.msra.mxu0 %v70_v0  ;;  %v146_v3 = vld [vmem:[#allocation2 + $0x78] sm:$0xff]  ;;  %v145_v4 = vld [vmem:[#allocation2 + $0x70] sm:$0xff]  ;;  %s273_s12 = sshll.u32 %s484_s9, 4  ;;  %s274_s12 = int_to_ptr.hbm [resolvable:$true] %s273_s12 }
   0xe   :  { %284 = vmatmul.msk.f32.vlgmr.msra.gmra.mxu0 %vm71_vm0, %v68_v1  ;;  %147 = vmatpush.msra.mxu2 %v146_v3  ;;  %v144_v5 = vld [vmem:[#allocation2 + $0x68] sm:$0xff]  ;;  %v143_v6 = vld [vmem:[#allocation2 + $0x60] sm:$0xff]  ;;  %v142_v7 = vld [vmem:[#allocation2 + $0x58] sm:$0xff] }
   0xf   :  { %v141_v8 = vld [vmem:[#allocation2 + $0x50] sm:$0xff]  ;;  %v140_v9 = vld [vmem:[#allocation2 + $0x48] sm:$0xff]  ;;  %v139_v10 = vld [vmem:[#allocation2 + $0x40] sm:$0xff] }
  0x10   :  { %148 = vmatpush.msra.mxu2 %v145_v4  ;;  %v138_v11 = vld [vmem:[#allocation2 + $0x38] sm:$0xff]  ;;  %v137_v12 = vld [vmem:[#allocation2 + $0x30] sm:$0xff]  ;;  %v136_v14 = vld [vmem:[#allocation2 + $0x28] sm:$0xff] }
  0x11   :  { %v135_v15 = vld [vmem:[#allocation2 + $0x20] sm:$0xff]  ;;  %v134_v16 = vld [vmem:[#allocation2 + $0x18] sm:$0xff]  ;;  %v133_v20 = vld [vmem:[#allocation2 + $0x10] sm:$0xff] }
  0x12   :  { %149 = vmatpush.msra.mxu2 %v144_v5  ;;  %v293_v19 = vld [vmem:[%s475_s0] sm:$0xff]  ;;  %v132_v21 = vld [vmem:[#allocation2 + $0x8] sm:$0xff]  ;;  %v230_v33 = vld [vmem:[#allocation5 + $0x78] sm:$0xff] }
  0x13   :  { %v131_v22 = vld [vmem:[#allocation2] sm:$0xff]  ;;  %v229_v34 = vld [vmem:[#allocation5 + $0x70] sm:$0xff]  ;;  %v228_v35 = vld [vmem:[#allocation5 + $0x68] sm:$0xff] }
  0x14   :  { %150 = vmatpush.msra.mxu2 %v143_v6  ;;  %v299_v23 = vld [vmem:[%s478_s3] ss:$0 sm:$0xff]  ;;  %v226_v37 = vld [vmem:[#allocation5 + $0x58] sm:$0xff]  ;;  %v225_v38 = vld [vmem:[#allocation5 + $0x50] sm:$0xff] }
  0x15   :  { %v227_v36 = vld [vmem:[#allocation5 + $0x60] sm:$0xff]  ;;  %v224_v39 = vld [vmem:[#allocation5 + $0x48] sm:$0xff]  ;;  %v222_v41 = vld [vmem:[#allocation5 + $0x38] sm:$0xff] }
  0x16   :  { %285 = vmatmul.msk.f32.gmra.mxu0 %vm71_vm0, %v69_v2  ;;  %151 = vmatpush.msra.mxu2 %v142_v7  ;;  %v223_v40 = vld [vmem:[#allocation5 + $0x40] sm:$0xff]  ;;  %v221_v43 = vld [vmem:[#allocation5 + $0x30] sm:$0xff]  ;;  %v220_v44 = vld [vmem:[#allocation5 + $0x28] sm:$0xff] }
  0x17   :  { %v219_v45 = vld [vmem:[#allocation5 + $0x20] sm:$0xff]  ;;  %v218_v47 = vld [vmem:[#allocation5 + $0x18] sm:$0xff]  ;;  %v217_v49 = vld [vmem:[#allocation5 + $0x10] sm:$0xff] }
  0x18   :  { %152 = vmatpush.msra.mxu2 %v141_v8  ;;  %v300_v46 = vld [vmem:[%s480_s5] ss:$0 sm:$0xff]  ;;  %v216_v52 = vld [vmem:[#allocation5 + $0x8] sm:$0xff] }
  0x19   :  { %v191_v55 = vld [vmem:[%s481_s6] sm:$0xff]  ;;  %s388_s6 = smov [#allocation7]  }
  0x1a   :  { %153 = vmatpush.msra.mxu2 %v140_v9  ;;  %v215_v56 = vld [vmem:[#allocation5] sm:$0xff]  ;;  %s271_s30 = sshll.u32 %s388_s6, 4  ;;  %s272_s30 = int_to_ptr.vmem [resolvable:$true] %s271_s30 }
  0x1b   :  { %v301_v58 = vld [vmem:[%s483_s8] ss:$0 sm:$0xff] }
  0x1c   :  { %154 = vmatpush.msra.mxu2 %v139_v10 }
  0x1e   :  { %155 = vmatpush.msra.mxu2 %v138_v11 }
  0x20   :  { %156 = vmatpush.msra.mxu2 %v137_v12 }
  0x22   :  { %157 = vmatpush.msra.mxu2 %v136_v14 }
  0x24   :  { %158 = vmatpush.msra.mxu2 %v135_v15 }
  0x26   :  { %159 = vmatpush.msra.mxu2 %v134_v16 }
  0x28   :  { %160 = vmatpush.msra.mxu2 %v133_v20 }
  0x2a   :  { %161 = vmatpush.msra.mxu2 %v132_v21 }
  0x2c   :  { %162 = vmatpush.msra.mxu2 %v131_v22 }
  0x8b   :  { %v95_v13 = vpop.f32.mrf.mxu0 }
  0x93   :  { %v98_v17 = vpop.f32.mrf.mxu0 }
  0x94   :  { %v101_v18 = vpack.c.bf16 %v98_v17, %v95_v13 }
  0x96   :  { %122 = vmatpush.bf16.msra.mxu1 %v101_v18 }
  0x99   :  { %290 = vmatmul.msk.bf16.vlgmr.msra.gmra.mxu1 %vm111_vm1, %v293_v19 }
  0x9a   :  { %235 = vmatpush.msrb.mxu1 %v230_v33 }
  0x9c   :  { %236 = vmatpush.msrb.mxu1 %v229_v34 }
  0x9e   :  { %237 = vmatpush.msrb.mxu1 %v228_v35 }
  0xa0   :  { %238 = vmatpush.msrb.mxu1 %v227_v36 }
  0xa2   :  { %239 = vmatpush.msrb.mxu1 %v226_v37 }
  0xa4   :  { %240 = vmatpush.msrb.mxu1 %v225_v38 }
  0xa6   :  { %241 = vmatpush.msrb.mxu1 %v224_v39 }
  0xa8   :  { %242 = vmatpush.msrb.mxu1 %v223_v40 }
  0xaa   :  { %243 = vmatpush.msrb.mxu1 %v222_v41 }
  0xac   :  { %244 = vmatpush.msrb.mxu1 %v221_v43 }
  0xae   :  { %245 = vmatpush.msrb.mxu1 %v220_v44 }
  0xb0   :  { %246 = vmatpush.msrb.mxu1 %v219_v45 }
  0xb2   :  { %247 = vmatpush.msrb.mxu1 %v218_v47 }
  0xb4   :  { %248 = vmatpush.msrb.mxu1 %v217_v49 }
  0xb6   :  { %249 = vmatpush.msrb.mxu1 %v216_v52 }
  0xb8   :  { %250 = vmatpush.msrb.mxu1 %v215_v56 }
 0x116   :  { %v124_v24 = vpop.f32.mrf.mxu1 }
 0x117   :  { %v125_v25 = vadd.f32 %v299_v23, %v124_v24 }
 0x119   :  { %v129_v26 = vmax.f32 %v125_v25, 0.0 }
 0x11b   :  { %163 = vmatmul.f32.vlgmr.msra.gmra.mxu2 %v129_v26 }
 0x11e   :  { %v126_v27 = vpop.f32.mrf.mxu1 }
 0x11f   :  { %v127_v28 = vadd.f32 %v299_v23, %v126_v27 }
 0x121   :  { %v130_v29 = vmax.f32 %v127_v28, 0.0 }
 0x123   :  { %166 = vmatmul.f32.gmra.mxu2 %v130_v29 }
 0x19e   :  { %v164_v30 = vpop.f32.mrf.mxu2 }
 0x1a6   :  { %v167_v31 = vpop.f32.mrf.mxu2 }
 0x1a7   :  { %v170_v32 = vpack.c.bf16 %v167_v31, %v164_v30 }
 0x1a9   :  { %182 = vmatpush.bf16.msra.mxu3 %v170_v32 }
 0x1ac   :  { %291 = vmatmul.msk.bf16.vlgmr.msra.gmra.mxu3 %vm111_vm1, %v293_v19 }
 0x22f   :  { %v184_v42 = vpop.f32.mrf.mxu3 }
 0x230   :  { %v185_v50 = vadd.f32 %v300_v46, %v184_v42 }
 0x232   :  { %v189_v54 = vmax.f32 %v185_v50, 0.0 }
 0x237   :  { %v186_v48 = vpop.f32.mrf.mxu3 }
 0x238   :  { %v187_v51 = vadd.f32 %v300_v46, %v186_v48 }
 0x23a   :  { %v190_v53 = vmax.f32 %v187_v51, 0.0 }
 0x23c   :  { %209 = vmatpush.msrb.mxu0 %v190_v53 }
 0x23e   :  { %210 = vmatpush.msrb.mxu0 %v189_v54 }
 0x23f   :  { %292 = vmatmul.msk.f32.vlgmr.msrb.gmra.mxu0 %vm111_vm1, %v191_v55 }
 0x2bc   :  { %v212_v57 = vpop.f32.mrf.mxu0 }
 0x2bd   :  { %251 = vmatmul.f32.vlgmr.msrb.gmra.mxu1 %v212_v57 }
 0x33a   :  { %v252_v59 = vpop.f32.mrf.mxu1 }
 0x33b   :  { %v253_v60 = vadd.f32 %v301_v58, %v252_v59 }
 0x33d   :  { %255 = vmax.xlane.f32.xlu0 %v253_v60 }
 0x3b0   :  { %v256_v61 = vpop.xlane.xlu0 %255 }
 0x3b1   :  { %v257_v62 = vsub.f32 %v253_v60, %v256_v61 }
 0x3b3   :  { %v258_v63 = vmul.f32 1.442695, %v257_v62 }
 0x3b5   :  { %302 = vpow2.f32 %v258_v63 }
 0x3bb   :  { %v303_v0 = vpop.eup %302 }
 0x3bc   :  { %260 = vadd.xlane.f32.xlu0 %v303_v0 }
 0x42f   :  { %v261_v1 = vpop.xlane.xlu0 %260 }
 0x430   :  { %304 = vlog2.f32 %v261_v1 }
 0x436   :  { %v305_v2 = vpop.eup %304 }
 0x437   :  { %v263_v3 = vmul.f32 0.6931472, %v305_v2 }
 0x439   :  { %v264_v4 = vsub.f32 %v257_v62, %v263_v3 }
 0x43b   :  { %265 = vst [vmem:[#allocation7] sm:$0xff] %v264_v4 }
 0x43c   :  { %276 = dma.vmem_to_hbm [thread:$0]  %s272_s30, 128, %s274_s12, [#allocation4]  }
 0x43d   :  { %382 = dma.done.wait [#allocation4], 128  }
 0x43e   :  { %383 = vsyncadd [#allocation4], 4294967168 }
 0x43f   :  { %281 = vsyncpa [#allocation3], 1 }
 0x440   :  { %282 = vsyncpa [#allocation6], 1 }
 0x441   :  { %283 = vsyncpa [#allocation4], 1 }

</bundles_post_ra>
